<compile_context>
chip_gen: v7x
topology: tpu7x:2x2x1
jax: 0.10.0
libtpu: 0.0.40
codegen_flags: <defaults>
</compile_context>

<pallas_src>
import jax
import jax.numpy as jnp
from jax.experimental import pallas as pl
from jax.experimental.pallas import tpu as pltpu

# --- small deterministic configuration --------------------------------------
B = 2            # batch size
S = 8            # max sequence length
F = 32           # in_features == out_features (required for stacking layers)
NUM_DEP = 4      # num_dependencies
NUM_REL = NUM_DEP + 1   # relations in adj (self-loop relation included)
NUM_LAYERS = 2   # num_layer
BS = B * S
LANE = 128       # per-relation lane-block width in the packed weight slab


def rgcn_kernel(x_ref, adj_ref, w_ref, out_ref):
    """Whole R_GCN_module forward in one invocation.

    x_ref   : [BS, F]              flattened node features
    adj_ref : [R, BS, BS]          row-degree-normalized, batch-block-diagonal adjacency
    w_ref   : [L, F, R*128]        lane-packed weights; relation r's [F,F] block at
                                   lanes [r*128, r*128+F), score column at lane r*128+F
    out_ref : [BS, F]
    """
    x = x_ref[...]                                   # [BS, F]
    adj = adj_ref[...]                               # [R, BS, BS]

    for l in range(NUM_LAYERS):
        # one wide projection matmul per layer (all relations + score columns)
        h_all = jnp.dot(x, w_ref[l], preferred_element_type=jnp.float32)   # [BS, R*128]

        div_list = []
        score_list = []
        for r in range(NUM_REL):
            # neighborhood aggregation on this relation's 128-lane block
            agg = jnp.dot(adj[r], h_all[:, r * LANE:(r + 1) * LANE],
                          preferred_element_type=jnp.float32)              # [BS, 128]
            div_list.append(agg[:, :F])                                    # normalized message
            score_list.append(agg[:, F:F + 1])                             # relation score (bias cancels)

        # softmax over relations, computed online (no [BS, R] matrix needed)
        m = score_list[0]
        for r in range(1, NUM_REL):
            m = jnp.maximum(m, score_list[r])
        acc = jnp.zeros_like(div_list[0])                                   # [BS, F]
        norm = jnp.zeros_like(m)                                            # [BS, 1]
        for r in range(NUM_REL):
            e = jnp.exp(score_list[r] - m)                                  # [BS, 1]
            norm = norm + e
            acc = acc + e * div_list[r]

        # weighted relation mix + ReLU; feeds the next layer
        x = jnp.maximum(acc * pl.reciprocal(norm, approx=False), 0.0)

    out_ref[...] = x


def pack_weights(weights, score_ws):
    """Hoisted setup-time packing: [L, F, R*128] lane-packed weight slab.

    Relation r of layer l occupies lanes [r*128, r*128+F) with W[l,r] and lane
    r*128+F with the score column W[l,r] @ score_w[l]. Valid only because the
    score Linear is shared across relations (its bias cancels in the softmax
    over relations); per-relation score linears would need a different packing.
    """
    w_packed = jnp.zeros((NUM_LAYERS, F, NUM_REL * LANE), jnp.float32)
    for l in range(NUM_LAYERS):
        for r in range(NUM_REL):
            w_lr = weights[l][r]                                   # [F, F]
            col = w_lr @ score_ws[l].reshape(F, 1)                 # [F, 1]
            blk = jnp.concatenate([w_lr, col], axis=1)             # [F, F+1]
            w_packed = w_packed.at[l, :, r * LANE:r * LANE + F + 1].set(blk)
    return w_packed


@jax.jit
def r_gcn_module(x, adj, w_packed):
    """x: [B,S,F] f32, adj: [B,R,S,S] f32, w_packed: [L,F,R*128] f32 (from pack_weights)."""
    # fold guarded 1/row-degree into adj (exact row scaling; adj is layer-invariant)
    denom = jnp.sum(adj, axis=3, keepdims=True)                            # [B,R,S,1]
    adj_n = adj / jnp.where(denom == 0.0, 1.0, denom)                      # [B,R,S,S]

    # block-diagonalize over the batch with a single einsum (no .at[].set loop)
    eye_b = jnp.eye(B, dtype=jnp.float32)
    adj_bd = jnp.einsum('brij,bc->rbicj', adj_n, eye_b).reshape(NUM_REL, BS, BS)

    x_flat = x.reshape(BS, F)

    out = pl.pallas_call(
        rgcn_kernel,
        out_shape=jax.ShapeDtypeStruct((BS, F), jnp.float32),
        grid_spec=pltpu.PrefetchScalarGridSpec(
            num_scalar_prefetch=0,
            grid=(1,),                       # single grid step: batch + both layers fused
            in_specs=[
                pl.BlockSpec((BS, F), lambda i: (0, 0)),
                pl.BlockSpec((NUM_REL, BS, BS), lambda i: (0, 0, 0)),
                pl.BlockSpec((NUM_LAYERS, F, NUM_REL * LANE), lambda i: (0, 0, 0)),
            ],
            out_specs=pl.BlockSpec((BS, F), lambda i: (0, 0)),
        ),
        compiler_params=pltpu.CompilerParams(
            dimension_semantics=("arbitrary",)),
    )(x_flat, adj_bd, w_packed)
    return out.reshape(B, S, F)


def reference(x, adj, weights, score_ws, score_bs):
    """Pure-JAX mirror of the PyTorch R_GCN_module.forward (regularization=None)."""
    denom = jnp.sum(adj, axis=3, keepdims=True)                            # [B,R,S,1]
    safe = jnp.where(denom == 0.0, jnp.ones_like(denom), denom)
    for l in range(NUM_LAYERS):
        hidden = jnp.einsum('bsf,rfg->brsg', x, weights[l])                # [B,R,S,F]
        intm = jnp.matmul(adj, hidden)                                     # [B,R,S,F]
        div = intm / safe                                                  # [B,R,S,F]
        scores = jnp.einsum('brsg,g->brs', div, score_ws[l]) + score_bs[l]
        coeffs = jax.nn.softmax(scores, axis=1)                            # over relations
        out = jnp.einsum('brsg,brs->bsg', div, coeffs)                     # [B,S,F]
        x = jax.nn.relu(out)
    return x


if __name__ == "__main__":
    key = jax.random.PRNGKey(0)
    ks = jax.random.split(key, 4 + NUM_LAYERS)

    # node features
    x = jax.random.normal(ks[0], (B, S, F), jnp.float32)

    # random sparse adjacency per relation; force some all-zero rows to
    # exercise the denom==0 guard
    adj = (jax.random.uniform(ks[1], (B, NUM_REL, S, S)) < 0.35).astype(jnp.float32)
    adj = adj.at[0, 1, 3, :].set(0.0)
    adj = adj.at[1, 2, 5, :].set(0.0)

    weights, score_ws, score_bs = [], [], []
    bound = 1.0 / jnp.sqrt(jnp.float32(F))
    for l in range(NUM_LAYERS):
        kw, ksw, ksb = jax.random.split(ks[2 + l], 3)
        weights.append(jax.random.normal(kw, (NUM_REL, F, F), jnp.float32) * bound)
        score_ws.append(jax.random.uniform(ksw, (F,), jnp.float32, -bound, bound))
        score_bs.append(jax.random.uniform(ksb, (), jnp.float32, -bound, bound))

    # setup-time weight packing (hoisted out of the per-call path)
    w_packed = pack_weights(weights, score_ws)

    out = jax.block_until_ready(r_gcn_module(x, adj, w_packed))
    ref = jax.block_until_ready(reference(x, adj, weights, score_ws, score_bs))

    assert out.shape == (B, S, F), out.shape
    assert jnp.allclose(out, ref, rtol=1e-2, atol=1e-2), (out, ref)

    print("KERNEL_OK")
</pallas_src>

<mosaic_0001>
module attributes {stable_mosaic.version = 11 : i64} {
  func.func @rgcn_kernel(%arg0: i32, %arg1: memref<16x32xf32, #tpu.memory_space<vmem>>, %arg2: memref<5x16x16xf32, #tpu.memory_space<vmem>>, %arg3: memref<2x32x640xf32, #tpu.memory_space<vmem>>, %arg4: memref<16x32xf32, #tpu.memory_space<vmem>>) attributes {dimension_semantics = [#tpu.dimension_semantics<arbitrary>], iteration_bounds = array<i64: 1>, scalar_prefetch = 0 : i64, scratch_operands = 0 : i64, tpu.core_type = #tpu.core_type<tc>, window_params = [{pipeline_mode = #tpu.pipeline_mode<synchronous>, transform_indices = @transform_0, window_bounds = array<i64: 16, 32>}, {pipeline_mode = #tpu.pipeline_mode<synchronous>, transform_indices = @transform_1, window_bounds = array<i64: 5, 16, 16>}, {pipeline_mode = #tpu.pipeline_mode<synchronous>, transform_indices = @transform_2, window_bounds = array<i64: 2, 32, 640>}, {pipeline_mode = #tpu.pipeline_mode<synchronous>, transform_indices = @transform_3, window_bounds = array<i64: 16, 32>}]} {
    %c0 = arith.constant 0 : index
    %c0_0 = arith.constant 0 : index
    %0 = vector.load %arg1[%c0, %c0_0] : memref<16x32xf32, #tpu.memory_space<vmem>>, vector<16x32xf32>
    %c0_1 = arith.constant 0 : index
    %c0_2 = arith.constant 0 : index
    %c0_3 = arith.constant 0 : index
    %1 = vector.load %arg2[%c0_1, %c0_2, %c0_3] : memref<5x16x16xf32, #tpu.memory_space<vmem>>, vector<5x16x16xf32>
    %c0_4 = arith.constant 0 : index
    %c0_5 = arith.constant 0 : index
    %c0_6 = arith.constant 0 : index
    %2 = vector.load %arg3[%c0_4, %c0_5, %c0_6] : memref<2x32x640xf32, #tpu.memory_space<vmem>>, vector<1x32x640xf32>
    %3 = vector.shape_cast %2 : vector<1x32x640xf32> to vector<32x640xf32>
    %cst = arith.constant dense<0.000000e+00> : vector<16x640xf32>
    %4 = tpu.matmul %0, %3, %cst {dimension_numbers = #tpu.dot_dimension_numbers<[1], [0], [0], [1], [0, 0, 1, 1], [], []>} : vector<16x32xf32>, vector<32x640xf32>, vector<16x640xf32> -> vector<16x640xf32>
    %5 = vector.extract_strided_slice %1 {offsets = [0, 0, 0], sizes = [1, 16, 16], strides = [1, 1, 1]} : vector<5x16x16xf32> to vector<1x16x16xf32>
    %6 = vector.shape_cast %5 : vector<1x16x16xf32> to vector<16x16xf32>
    %7 = vector.extract_strided_slice %4 {offsets = [0, 0], sizes = [16, 128], strides = [1, 1]} : vector<16x640xf32> to vector<16x128xf32>
    %cst_7 = arith.constant dense<0.000000e+00> : vector<16x128xf32>
    %8 = tpu.matmul %6, %7, %cst_7 {dimension_numbers = #tpu.dot_dimension_numbers<[1], [0], [0], [1], [0, 0, 1, 1], [], []>} : vector<16x16xf32>, vector<16x128xf32>, vector<16x128xf32> -> vector<16x128xf32>
    %9 = vector.extract_strided_slice %8 {offsets = [0, 0], sizes = [16, 32], strides = [1, 1]} : vector<16x128xf32> to vector<16x32xf32>
    %10 = vector.extract_strided_slice %8 {offsets = [0, 32], sizes = [16, 1], strides = [1, 1]} : vector<16x128xf32> to vector<16x1xf32>
    %11 = vector.extract_strided_slice %1 {offsets = [1, 0, 0], sizes = [1, 16, 16], strides = [1, 1, 1]} : vector<5x16x16xf32> to vector<1x16x16xf32>
    %12 = vector.shape_cast %11 : vector<1x16x16xf32> to vector<16x16xf32>
    %13 = vector.extract_strided_slice %4 {offsets = [0, 128], sizes = [16, 128], strides = [1, 1]} : vector<16x640xf32> to vector<16x128xf32>
    %cst_8 = arith.constant dense<0.000000e+00> : vector<16x128xf32>
    %14 = tpu.matmul %12, %13, %cst_8 {dimension_numbers = #tpu.dot_dimension_numbers<[1], [0], [0], [1], [0, 0, 1, 1], [], []>} : vector<16x16xf32>, vector<16x128xf32>, vector<16x128xf32> -> vector<16x128xf32>
    %15 = vector.extract_strided_slice %14 {offsets = [0, 0], sizes = [16, 32], strides = [1, 1]} : vector<16x128xf32> to vector<16x32xf32>
    %16 = vector.extract_strided_slice %14 {offsets = [0, 32], sizes = [16, 1], strides = [1, 1]} : vector<16x128xf32> to vector<16x1xf32>
    %17 = vector.extract_strided_slice %1 {offsets = [2, 0, 0], sizes = [1, 16, 16], strides = [1, 1, 1]} : vector<5x16x16xf32> to vector<1x16x16xf32>
    %18 = vector.shape_cast %17 : vector<1x16x16xf32> to vector<16x16xf32>
    %19 = vector.extract_strided_slice %4 {offsets = [0, 256], sizes = [16, 128], strides = [1, 1]} : vector<16x640xf32> to vector<16x128xf32>
    %cst_9 = arith.constant dense<0.000000e+00> : vector<16x128xf32>
    %20 = tpu.matmul %18, %19, %cst_9 {dimension_numbers = #tpu.dot_dimension_numbers<[1], [0], [0], [1], [0, 0, 1, 1], [], []>} : vector<16x16xf32>, vector<16x128xf32>, vector<16x128xf32> -> vector<16x128xf32>
    %21 = vector.extract_strided_slice %20 {offsets = [0, 0], sizes = [16, 32], strides = [1, 1]} : vector<16x128xf32> to vector<16x32xf32>
    %22 = vector.extract_strided_slice %20 {offsets = [0, 32], sizes = [16, 1], strides = [1, 1]} : vector<16x128xf32> to vector<16x1xf32>
    %23 = vector.extract_strided_slice %1 {offsets = [3, 0, 0], sizes = [1, 16, 16], strides = [1, 1, 1]} : vector<5x16x16xf32> to vector<1x16x16xf32>
    %24 = vector.shape_cast %23 : vector<1x16x16xf32> to vector<16x16xf32>
    %25 = vector.extract_strided_slice %4 {offsets = [0, 384], sizes = [16, 128], strides = [1, 1]} : vector<16x640xf32> to vector<16x128xf32>
    %cst_10 = arith.constant dense<0.000000e+00> : vector<16x128xf32>
    %26 = tpu.matmul %24, %25, %cst_10 {dimension_numbers = #tpu.dot_dimension_numbers<[1], [0], [0], [1], [0, 0, 1, 1], [], []>} : vector<16x16xf32>, vector<16x128xf32>, vector<16x128xf32> -> vector<16x128xf32>
    %27 = vector.extract_strided_slice %26 {offsets = [0, 0], sizes = [16, 32], strides = [1, 1]} : vector<16x128xf32> to vector<16x32xf32>
    %28 = vector.extract_strided_slice %26 {offsets = [0, 32], sizes = [16, 1], strides = [1, 1]} : vector<16x128xf32> to vector<16x1xf32>
    %29 = vector.extract_strided_slice %1 {offsets = [4, 0, 0], sizes = [1, 16, 16], strides = [1, 1, 1]} : vector<5x16x16xf32> to vector<1x16x16xf32>
    %30 = vector.shape_cast %29 : vector<1x16x16xf32> to vector<16x16xf32>
    %31 = vector.extract_strided_slice %4 {offsets = [0, 512], sizes = [16, 128], strides = [1, 1]} : vector<16x640xf32> to vector<16x128xf32>
    %cst_11 = arith.constant dense<0.000000e+00> : vector<16x128xf32>
    %32 = tpu.matmul %30, %31, %cst_11 {dimension_numbers = #tpu.dot_dimension_numbers<[1], [0], [0], [1], [0, 0, 1, 1], [], []>} : vector<16x16xf32>, vector<16x128xf32>, vector<16x128xf32> -> vector<16x128xf32>
    %33 = vector.extract_strided_slice %32 {offsets = [0, 0], sizes = [16, 32], strides = [1, 1]} : vector<16x128xf32> to vector<16x32xf32>
    %34 = vector.extract_strided_slice %32 {offsets = [0, 32], sizes = [16, 1], strides = [1, 1]} : vector<16x128xf32> to vector<16x1xf32>
    %35 = arith.maximumf %10, %16 : vector<16x1xf32>
    %36 = arith.maximumf %35, %22 : vector<16x1xf32>
    %37 = arith.maximumf %36, %28 : vector<16x1xf32>
    %38 = arith.maximumf %37, %34 : vector<16x1xf32>
    %cst_12 = arith.constant 0.000000e+00 : f32
    %39 = vector.broadcast %cst_12 : f32 to vector<16x32xf32>
    %cst_13 = arith.constant 0.000000e+00 : f32
    %40 = vector.broadcast %cst_13 : f32 to vector<16x1xf32>
    %41 = arith.subf %10, %38 : vector<16x1xf32>
    %42 = math.exp %41 : vector<16x1xf32>
    %43 = arith.addf %40, %42 : vector<16x1xf32>
    %44 = vector.broadcast %42 : vector<16x1xf32> to vector<16x32xf32>
    %45 = arith.mulf %44, %9 : vector<16x32xf32>
    %46 = arith.addf %39, %45 : vector<16x32xf32>
    %47 = arith.subf %16, %38 : vector<16x1xf32>
    %48 = math.exp %47 : vector<16x1xf32>
    %49 = arith.addf %43, %48 : vector<16x1xf32>
    %50 = vector.broadcast %48 : vector<16x1xf32> to vector<16x32xf32>
    %51 = arith.mulf %50, %15 : vector<16x32xf32>
    %52 = arith.addf %46, %51 : vector<16x32xf32>
    %53 = arith.subf %22, %38 : vector<16x1xf32>
    %54 = math.exp %53 : vector<16x1xf32>
    %55 = arith.addf %49, %54 : vector<16x1xf32>
    %56 = vector.broadcast %54 : vector<16x1xf32> to vector<16x32xf32>
    %57 = arith.mulf %56, %21 : vector<16x32xf32>
    %58 = arith.addf %52, %57 : vector<16x32xf32>
    %59 = arith.subf %28, %38 : vector<16x1xf32>
    %60 = math.exp %59 : vector<16x1xf32>
    %61 = arith.addf %55, %60 : vector<16x1xf32>
    %62 = vector.broadcast %60 : vector<16x1xf32> to vector<16x32xf32>
    %63 = arith.mulf %62, %27 : vector<16x32xf32>
    %64 = arith.addf %58, %63 : vector<16x32xf32>
    %65 = arith.subf %34, %38 : vector<16x1xf32>
    %66 = math.exp %65 : vector<16x1xf32>
    %67 = arith.addf %61, %66 : vector<16x1xf32>
    %68 = vector.broadcast %66 : vector<16x1xf32> to vector<16x32xf32>
    %69 = arith.mulf %68, %33 : vector<16x32xf32>
    %70 = arith.addf %64, %69 : vector<16x32xf32>
    %71 = tpu.reciprocal %67 : vector<16x1xf32> -> vector<16x1xf32>
    %72 = vector.broadcast %71 : vector<16x1xf32> to vector<16x32xf32>
    %73 = arith.mulf %70, %72 : vector<16x32xf32>
    %cst_14 = arith.constant 0.000000e+00 : f32
    %74 = vector.broadcast %cst_14 : f32 to vector<16x32xf32>
    %75 = arith.maximumf %73, %74 : vector<16x32xf32>
    %c1 = arith.constant 1 : index
    %c0_15 = arith.constant 0 : index
    %c0_16 = arith.constant 0 : index
    %76 = vector.load %arg3[%c1, %c0_15, %c0_16] : memref<2x32x640xf32, #tpu.memory_space<vmem>>, vector<1x32x640xf32>
    %77 = vector.shape_cast %76 : vector<1x32x640xf32> to vector<32x640xf32>
    %cst_17 = arith.constant dense<0.000000e+00> : vector<16x640xf32>
    %78 = tpu.matmul %75, %77, %cst_17 {dimension_numbers = #tpu.dot_dimension_numbers<[1], [0], [0], [1], [0, 0, 1, 1], [], []>} : vector<16x32xf32>, vector<32x640xf32>, vector<16x640xf32> -> vector<16x640xf32>
    %79 = vector.extract_strided_slice %1 {offsets = [0, 0, 0], sizes = [1, 16, 16], strides = [1, 1, 1]} : vector<5x16x16xf32> to vector<1x16x16xf32>
    %80 = vector.shape_cast %79 : vector<1x16x16xf32> to vector<16x16xf32>
    %81 = vector.extract_strided_slice %78 {offsets = [0, 0], sizes = [16, 128], strides = [1, 1]} : vector<16x640xf32> to vector<16x128xf32>
    %cst_18 = arith.constant dense<0.000000e+00> : vector<16x128xf32>
    %82 = tpu.matmul %80, %81, %cst_18 {dimension_numbers = #tpu.dot_dimension_numbers<[1], [0], [0], [1], [0, 0, 1, 1], [], []>} : vector<16x16xf32>, vector<16x128xf32>, vector<16x128xf32> -> vector<16x128xf32>
    %83 = vector.extract_strided_slice %82 {offsets = [0, 0], sizes = [16, 32], strides = [1, 1]} : vector<16x128xf32> to vector<16x32xf32>
    %84 = vector.extract_strided_slice %82 {offsets = [0, 32], sizes = [16, 1], strides = [1, 1]} : vector<16x128xf32> to vector<16x1xf32>
    %85 = vector.extract_strided_slice %1 {offsets = [1, 0, 0], sizes = [1, 16, 16], strides = [1, 1, 1]} : vector<5x16x16xf32> to vector<1x16x16xf32>
    %86 = vector.shape_cast %85 : vector<1x16x16xf32> to vector<16x16xf32>
    %87 = vector.extract_strided_slice %78 {offsets = [0, 128], sizes = [16, 128], strides = [1, 1]} : vector<16x640xf32> to vector<16x128xf32>
    %cst_19 = arith.constant dense<0.000000e+00> : vector<16x128xf32>
    %88 = tpu.matmul %86, %87, %cst_19 {dimension_numbers = #tpu.dot_dimension_numbers<[1], [0], [0], [1], [0, 0, 1, 1], [], []>} : vector<16x16xf32>, vector<16x128xf32>, vector<16x128xf32> -> vector<16x128xf32>
    %89 = vector.extract_strided_slice %88 {offsets = [0, 0], sizes = [16, 32], strides = [1, 1]} : vector<16x128xf32> to vector<16x32xf32>
    %90 = vector.extract_strided_slice %88 {offsets = [0, 32], sizes = [16, 1], strides = [1, 1]} : vector<16x128xf32> to vector<16x1xf32>
    %91 = vector.extract_strided_slice %1 {offsets = [2, 0, 0], sizes = [1, 16, 16], strides = [1, 1, 1]} : vector<5x16x16xf32> to vector<1x16x16xf32>
    %92 = vector.shape_cast %91 : vector<1x16x16xf32> to vector<16x16xf32>
    %93 = vector.extract_strided_slice %78 {offsets = [0, 256], sizes = [16, 128], strides = [1, 1]} : vector<16x640xf32> to vector<16x128xf32>
    %cst_20 = arith.constant dense<0.000000e+00> : vector<16x128xf32>
    %94 = tpu.matmul %92, %93, %cst_20 {dimension_numbers = #tpu.dot_dimension_numbers<[1], [0], [0], [1], [0, 0, 1, 1], [], []>} : vector<16x16xf32>, vector<16x128xf32>, vector<16x128xf32> -> vector<16x128xf32>
    %95 = vector.extract_strided_slice %94 {offsets = [0, 0], sizes = [16, 32], strides = [1, 1]} : vector<16x128xf32> to vector<16x32xf32>
    %96 = vector.extract_strided_slice %94 {offsets = [0, 32], sizes = [16, 1], strides = [1, 1]} : vector<16x128xf32> to vector<16x1xf32>
    %97 = vector.extract_strided_slice %1 {offsets = [3, 0, 0], sizes = [1, 16, 16], strides = [1, 1, 1]} : vector<5x16x16xf32> to vector<1x16x16xf32>
    %98 = vector.shape_cast %97 : vector<1x16x16xf32> to vector<16x16xf32>
    %99 = vector.extract_strided_slice %78 {offsets = [0, 384], sizes = [16, 128], strides = [1, 1]} : vector<16x640xf32> to vector<16x128xf32>
    %cst_21 = arith.constant dense<0.000000e+00> : vector<16x128xf32>
    %100 = tpu.matmul %98, %99, %cst_21 {dimension_numbers = #tpu.dot_dimension_numbers<[1], [0], [0], [1], [0, 0, 1, 1], [], []>} : vector<16x16xf32>, vector<16x128xf32>, vector<16x128xf32> -> vector<16x128xf32>
    %101 = vector.extract_strided_slice %100 {offsets = [0, 0], sizes = [16, 32], strides = [1, 1]} : vector<16x128xf32> to vector<16x32xf32>
    %102 = vector.extract_strided_slice %100 {offsets = [0, 32], sizes = [16, 1], strides = [1, 1]} : vector<16x128xf32> to vector<16x1xf32>
    %103 = vector.extract_strided_slice %1 {offsets = [4, 0, 0], sizes = [1, 16, 16], strides = [1, 1, 1]} : vector<5x16x16xf32> to vector<1x16x16xf32>
    %104 = vector.shape_cast %103 : vector<1x16x16xf32> to vector<16x16xf32>
    %105 = vector.extract_strided_slice %78 {offsets = [0, 512], sizes = [16, 128], strides = [1, 1]} : vector<16x640xf32> to vector<16x128xf32>
    %cst_22 = arith.constant dense<0.000000e+00> : vector<16x128xf32>
    %106 = tpu.matmul %104, %105, %cst_22 {dimension_numbers = #tpu.dot_dimension_numbers<[1], [0], [0], [1], [0, 0, 1, 1], [], []>} : vector<16x16xf32>, vector<16x128xf32>, vector<16x128xf32> -> vector<16x128xf32>
    %107 = vector.extract_strided_slice %106 {offsets = [0, 0], sizes = [16, 32], strides = [1, 1]} : vector<16x128xf32> to vector<16x32xf32>
    %108 = vector.extract_strided_slice %106 {offsets = [0, 32], sizes = [16, 1], strides = [1, 1]} : vector<16x128xf32> to vector<16x1xf32>
    %109 = arith.maximumf %84, %90 : vector<16x1xf32>
    %110 = arith.maximumf %109, %96 : vector<16x1xf32>
    %111 = arith.maximumf %110, %102 : vector<16x1xf32>
    %112 = arith.maximumf %111, %108 : vector<16x1xf32>
    %cst_23 = arith.constant 0.000000e+00 : f32
    %113 = vector.broadcast %cst_23 : f32 to vector<16x32xf32>
    %cst_24 = arith.constant 0.000000e+00 : f32
    %114 = vector.broadcast %cst_24 : f32 to vector<16x1xf32>
    %115 = arith.subf %84, %112 : vector<16x1xf32>
    %116 = math.exp %115 : vector<16x1xf32>
    %117 = arith.addf %114, %116 : vector<16x1xf32>
    %118 = vector.broadcast %116 : vector<16x1xf32> to vector<16x32xf32>
    %119 = arith.mulf %118, %83 : vector<16x32xf32>
    %120 = arith.addf %113, %119 : vector<16x32xf32>
    %121 = arith.subf %90, %112 : vector<16x1xf32>
    %122 = math.exp %121 : vector<16x1xf32>
    %123 = arith.addf %117, %122 : vector<16x1xf32>
    %124 = vector.broadcast %122 : vector<16x1xf32> to vector<16x32xf32>
    %125 = arith.mulf %124, %89 : vector<16x32xf32>
    %126 = arith.addf %120, %125 : vector<16x32xf32>
    %127 = arith.subf %96, %112 : vector<16x1xf32>
    %128 = math.exp %127 : vector<16x1xf32>
    %129 = arith.addf %123, %128 : vector<16x1xf32>
    %130 = vector.broadcast %128 : vector<16x1xf32> to vector<16x32xf32>
    %131 = arith.mulf %130, %95 : vector<16x32xf32>
    %132 = arith.addf %126, %131 : vector<16x32xf32>
    %133 = arith.subf %102, %112 : vector<16x1xf32>
    %134 = math.exp %133 : vector<16x1xf32>
    %135 = arith.addf %129, %134 : vector<16x1xf32>
    %136 = vector.broadcast %134 : vector<16x1xf32> to vector<16x32xf32>
    %137 = arith.mulf %136, %101 : vector<16x32xf32>
    %138 = arith.addf %132, %137 : vector<16x32xf32>
    %139 = arith.subf %108, %112 : vector<16x1xf32>
    %140 = math.exp %139 : vector<16x1xf32>
    %141 = arith.addf %135, %140 : vector<16x1xf32>
    %142 = vector.broadcast %140 : vector<16x1xf32> to vector<16x32xf32>
    %143 = arith.mulf %142, %107 : vector<16x32xf32>
    %144 = arith.addf %138, %143 : vector<16x32xf32>
    %145 = tpu.reciprocal %141 : vector<16x1xf32> -> vector<16x1xf32>
    %146 = vector.broadcast %145 : vector<16x1xf32> to vector<16x32xf32>
    %147 = arith.mulf %144, %146 : vector<16x32xf32>
    %cst_25 = arith.constant 0.000000e+00 : f32
    %148 = vector.broadcast %cst_25 : f32 to vector<16x32xf32>
    %149 = arith.maximumf %147, %148 : vector<16x32xf32>
    %c0_26 = arith.constant 0 : index
    %c0_27 = arith.constant 0 : index
    %150 = vector.load %arg4[%c0_26, %c0_27] : memref<16x32xf32, #tpu.memory_space<vmem>>, vector<16x32xf32>
    tpu.vector_store %arg4[%c0_26, %c0_27], %149 {strides = array<i32>} : memref<16x32xf32, #tpu.memory_space<vmem>>, vector<16x32xf32>,
    return
  }
  func.func @transform_0(%arg0: i32) -> (i32, i32) {
    %c0_i32 = arith.constant 0 : i32
    %c0_i32_0 = arith.constant 0 : i32
    %c0_i32_1 = arith.constant 0 : i32
    return %c0_i32, %c0_i32_0 : i32, i32
  }
  func.func @transform_1(%arg0: i32) -> (i32, i32, i32) {
    %c0_i32 = arith.constant 0 : i32
    %c0_i32_0 = arith.constant 0 : i32
    %c0_i32_1 = arith.constant 0 : i32
    %c0_i32_2 = arith.constant 0 : i32
    return %c0_i32, %c0_i32_0, %c0_i32_1 : i32, i32, i32
  }
  func.func @transform_2(%arg0: i32) -> (i32, i32, i32) {
    %c0_i32 = arith.constant 0 : i32
    %c0_i32_0 = arith.constant 0 : i32
    %c0_i32_1 = arith.constant 0 : i32
    %c0_i32_2 = arith.constant 0 : i32
    return %c0_i32, %c0_i32_0, %c0_i32_1 : i32, i32, i32
  }
  func.func @transform_3(%arg0: i32) -> (i32, i32) {
    %c0_i32 = arith.constant 0 : i32
    %c0_i32_0 = arith.constant 0 : i32
    %c0_i32_1 = arith.constant 0 : i32
    return %c0_i32, %c0_i32_0 : i32, i32
  }
}

</mosaic_0001>

<bundles_post_ra>
// kernel: r_gcn_module.1
= control target key start
LH: loop header
LB: loop body
LE: loop exit
PB: predicated region body
PF: predicated region fallthrough
CT: control target
= control target key end

     0   :  { %v1969_v7 = vmov 0.0   ;;  %s2344_s0 = inlined_call_operand.vmem [shape: f32[16,32], index: 0, kind: input, shape index: {}]   ;;  %s2345_s1 = inlined_call_operand.vmem [shape: f32[5,16,16], index: 1, kind: input, shape index: {}]   ;;  %s2346_s2 = inlined_call_operand.vmem [shape: f32[2,32,640], index: 2, kind: input, shape index: {}]   ;;  %s2347_s3 = inlined_call_operand.hbm [shape: f32[16,32], index: 3, kind: output, shape index: {}]  }
   0x1   :  { %v28_v0 = vld [vmem:[%s2346_s2 + $0x8] sm:$0xff]  ;;  %v33_v1 = vld [vmem:[%s2346_s2 + $0x30] sm:$0xff]  ;;  %v30_v2 = vld [vmem:[%s2346_s2 + $0x18] sm:$0xff]  ;;  %118 = vmatprep.mubr.f32.mxu0 %v1969_v7  ;;  %195 = vmatprep.mubr.f32.mxu1 %v1969_v7 }
   0x2   :  { %v1802_v3 = vpack.c.bf16 %v33_v1, %v28_v0  ;;  %v35_v4 = vld [vmem:[%s2346_s2 + $0x40] sm:$0xff]  ;;  %v32_v6 = vld [vmem:[%s2346_s2 + $0x28] sm:$0xff]  ;;  %v29_v10 = vld [vmem:[%s2346_s2 + $0x10] sm:$0xff] }
   0x3   :  { %v27_v5 = vld [vmem:[%s2346_s2] sm:$0xff]  ;;  %v1810_v8 = vpack.c.bf16 %v35_v4, %v30_v2  ;;  %v34_v11 = vld [vmem:[%s2346_s2 + $0x38] sm:$0xff]  ;;  %v40_v15 = vld [vmem:[%s2346_s2 + $0x68] sm:$0xff] }
   0x4   :  { %v1804_v9 = vpack.c.bf16 %v32_v6, %v27_v5  ;;  %v38_v12 = vld [vmem:[%s2346_s2 + $0x58] sm:$0xff]  ;;  %1803 = vmatprep.subr.bf16.mxu0 %v1802_v3  ;;  %v1812_v13 = vpack.c.bf16 %v34_v11, %v29_v10  ;;  %v43_v14 = vld [vmem:[%s2346_s2 + $0x80] sm:$0xff]  ;;  %v45_v16 = vld [vmem:[%s2346_s2 + $0x90] sm:$0xff] }
   0x5   :  { %1811 = vmatprep.subr.bf16.mxu1 %v1810_v8  ;;  %v1806_v17 = vpack.c.bf16 %v43_v14, %v38_v12  ;;  %v1814_v18 = vpack.c.bf16 %v45_v16, %v40_v15  ;;  %v37_v19 = vld [vmem:[%s2346_s2 + $0x50] sm:$0xff]  ;;  %v42_v20 = vld [vmem:[%s2346_s2 + $0x78] sm:$0xff]  ;;  %v39_v21 = vld [vmem:[%s2346_s2 + $0x60] sm:$0xff] }
   0x6   :  { %1805 = vmatpush1.bf16.msra.mxu0 %v1804_v9  ;;  %1813 = vmatpush1.bf16.msra.mxu1 %v1812_v13  ;;  %v1808_v22 = vpack.c.bf16 %v42_v20, %v37_v19  ;;  %v44_v23 = vld [vmem:[%s2346_s2 + $0x88] sm:$0xff]  ;;  %v31_v24 = vld [vmem:[%s2346_s2 + $0x20] sm:$0xff]  ;;  %v41_v28 = vld [vmem:[%s2346_s2 + $0x70] sm:$0xff] }
   0x7   :  { %1807 = vmatprep.subr.bf16.mxu0 %v1806_v17  ;;  %1815 = vmatprep.subr.bf16.mxu1 %v1814_v18  ;;  %v1816_v25 = vpack.c.bf16 %v44_v23, %v39_v21  ;;  %v36_v26 = vld [vmem:[%s2346_s2 + $0x48] sm:$0xff]  ;;  %v46_v29 = vld [vmem:[%s2346_s2 + $0x98] sm:$0xff] }
   0x8   :  { %v1818_v27 = vpack.c.bf16 %v36_v26, %v31_v24 }
   0x9   :  { %8 = vsyncpa [#allocation3], 0  ;;  %v15_v30 = vld [vmem:[%s2344_s0] sm:$0xff]  ;;  %vm47_vm0 = vcmask 261120   ;;  %v1822_v31 = vpack.c.bf16 %v46_v29, %v41_v28  ;;  %v16_v32 = vld [vmem:[%s2344_s0 + $0x8] sm:$0xff]  ;;  %vm283_vm1 = vcmask 130048  }
   0xa   :  { %1809 = vmatpush1.bf16.msra.mxu0 %v1808_v22  ;;  %1817 = vmatpush1.bf16.msra.mxu1 %v1816_v25  ;;  %v2073_v33 = vld [vmem:[%s2345_s1] sm:$0xff]  ;;  %v2080_v34 = vld [vmem:[%s2345_s1 + $0x10] sm:$0xff]  ;;  %v2087_v47 = vld [vmem:[%s2345_s1 + $0x8] sm:$0xff]  ;;  %v1970_v58 = vmov 32  }
   0xb   :  { %1819 = vmatprep.subr.bf16.mxu0 %v1818_v27  ;;  %v2092_v49 = vld [vmem:[%s2345_s1 + $0x18] sm:$0xff]  ;;  %v2097_v51 = vld [vmem:[%s2345_s1 + $0x20] sm:$0xff]  ;;  %v2104_v53 = vld [vmem:[%s2345_s1 + $0x30] sm:$0xff]  ;;  %1896 = vset.pattern.permute.xlu0 %v1970_v58 }
   0xc   :  { %v2111_v54 = vld [vmem:[%s2345_s1 + $0x28] sm:$0xff]  ;;  %v2118_v55 = vld [vmem:[%s2345_s1 + $0x38] sm:$0xff]  ;;  %v2125_v56 = vld [vmem:[%s2345_s1 + $0x40] sm:$0xff]  ;;  %1895 = vset.pattern.permute.xlu1 %v1970_v58 }
   0xd   :  { %1606 = vmatmul.mubr.msk.f32.vlgmr.msra.gmra.mrb[0].mxu0 %vm47_vm0, %v15_v30  ;;  %1608 = vmatmul.mubr.msk.f32.vlgmr.msra.gmra.mrb[0].mxu1 %vm47_vm0, %v15_v30  ;;  %v2134_v57 = vld [vmem:[%s2345_s1 + $0x48] sm:$0xff] }
   0xe   :  { %124 = vmatprep.mubr.f32.mxu0 %v1969_v7  ;;  %201 = vmatprep.mubr.f32.mxu1 %v1969_v7 }
   0xf   :  { %1821 = vmatpush3.bf16.msra.mxu0 %v1818_v27 }
  0x10   :  { %1823 = vmatprep.subr.bf16.mxu0 %v1822_v31 }
  0x11   :  { %1607 = vmatmul.mubr.msk.f32.gmra.mrb[2].mxu0 %vm47_vm0, %v16_v32  ;;  %1609 = vmatmul.mubr.msk.f32.gmra.mrb[2].mxu1 %vm47_vm0, %v16_v32 }
  0x12   :  { %1718 = vmatprep.mubr.msk.f32.mxu0 %vm47_vm0, %v15_v30  ;;  %1725 = vmatprep.mubr.msk.f32.mxu1 %vm283_vm1, %v2073_v33 }
  0x13   :  { %1825 = vmatpush3.bf16.msra.mxu0 %v1822_v31 }
  0x16   :  { %1719 = vmatmul.mubr.msk.f32.vlgmr.msra.gmra.mrb[4].mxu0 %vm47_vm0, %v16_v32 }
  0x17   :  { %1732 = vmatprep.mubr.msk.f32.mxu0 %vm283_vm1, %v2080_v34 }
  0xe0   :  { %v120_v35 = vpop.f32.mrb[0].mxu0  ;;  %v197_v37 = vpop.f32.mrb[0].mxu1 }
  0xe1   :  { %v122_v36 = vpop.f32.mrb[1].mxu0  ;;  %v199_v38 = vpop.f32.mrb[1].mxu1 }
  0xe4   :  { %v126_v39 = vpop.f32.mrb[2].mxu0  ;;  %v203_v41 = vpop.f32.mrb[2].mxu1 }
  0xe5   :  { %v1826_v40 = vpack.c.bf16 %v126_v39, %v120_v35  ;;  %v128_v42 = vpop.f32.mrb[3].mxu0  ;;  %v1834_v43 = vpack.c.bf16 %v203_v41, %v197_v37  ;;  %v205_v45 = vpop.f32.mrb[3].mxu1 }
  0xe6   :  { %v1830_v44 = vpack.c.bf16 %v128_v42, %v122_v36  ;;  %v1838_v46 = vpack.c.bf16 %v205_v45, %v199_v38 }
  0xe7   :  { %1827 = vmatprep.subr.bf16.mxu1 %v1826_v40 }
  0xe8   :  { %1829 = vmatpush3.bf16.msra.mxu1 %v1826_v40  ;;  %1831 = vmatprep.subr.bf16.mxu0 %v1830_v44 }
  0xe9   :  { %1833 = vmatpush3.bf16.msra.mxu0 %v1830_v44  ;;  %1835 = vmatprep.subr.bf16.mxu1 %v1834_v43  ;;  %v1720_v48 = vpop.f32.mrb[4].mxu0 }
  0xea   :  { %1839 = vmatprep.subr.bf16.mxu0 %v1838_v46  ;;  %v274_v50 = vpop.f32.mrb[5].mxu0 }
  0xeb   :  { %v1842_v52 = vpack.c.bf16 %v1720_v48, %v274_v50  ;;  %1726 = vmatmul.mubr.msk.f32.vlgmr.msra.gmra.mrb[4].mxu1 %vm283_vm1, %v2087_v47 }
  0xec   :  { %1733 = vmatmul.mubr.msk.f32.vlgmr.msra.gmra.mrb[6].mxu0 %vm283_vm1, %v2092_v49  ;;  %1837 = vmatpush3.bf16.msra.mxu1 %v1834_v43 }
  0xed   :  { %1841 = vmatpush3.bf16.msra.mxu0 %v1838_v46  ;;  %1739 = vmatprep.mubr.msk.f32.mxu1 %vm283_vm1, %v2097_v51 }
  0xee   :  { %1843 = vmatprep.subr.bf16.mxu1 %v1842_v52  ;;  %1746 = vmatprep.mubr.msk.f32.mxu0 %vm283_vm1, %v2104_v53 }
  0xef   :  { %1740 = vmatmul.mubr.msk.f32.vlgmr.msra.gmra.mrb[6].mxu1 %vm283_vm1, %v2111_v54 }
  0xf0   :  { %1747 = vmatmul.mubr.msk.f32.vlgmr.msra.gmra.mrb[8].mxu0 %vm283_vm1, %v2118_v55  ;;  %1845 = vmatpush3.bf16.msra.mxu1 %v1842_v52 }
  0xf1   :  { %1753 = vmatprep.mubr.msk.f32.mxu1 %vm283_vm1, %v2125_v56  ;;  %914 = vmatprep.mubr.f32.mxu0 %v1969_v7 }
  0xf3   :  { %1754 = vmatmul.mubr.msk.f32.vlgmr.msra.gmra.mrb[8].mxu1 %vm283_vm1, %v2134_v57 }
  0xf4   :  { %991 = vmatprep.mubr.f32.mxu1 %v1969_v7 }
 0x1be   :  { %v2142_v59 = vpop.f32.mrb[4].mxu1 }
 0x1bf   :  { %v2144_v60 = vpop.f32.mrb[5].mxu1  ;;  %v2146_v61 = vpop.f32.mrb[6].mxu0 }
 0x1c0   :  { %v690_v62 = vmax.f32 %v2142_v59, %v2146_v61  ;;  %v2150_v63 = vpop.f32.mrb[7].mxu0 }
 0x1c1   :  { %v689_v0 = vmax.f32 %v2144_v60, %v2150_v63 }
 0x1c2   :  { %v2154_v1 = vpop.f32.mrb[6].mxu1 }
 0x1c3   :  { %v692_v2 = vmax.f32 %v690_v62, %v2154_v1  ;;  %v2157_v3 = vpop.f32.mrb[7].mxu1  ;;  %v2159_v4 = vpop.f32.mrb[8].mxu0 }
 0x1c4   :  { %v691_v5 = vmax.f32 %v689_v0, %v2157_v3  ;;  %v2162_v6 = vpop.f32.mrb[9].mxu0 }
 0x1c5   :  { %v694_v8 = vmax.f32 %v692_v2, %v2159_v4 }
 0x1c6   :  { %v693_v9 = vmax.f32 %v691_v5, %v2162_v6  ;;  %v2166_v10 = vpop.f32.mrb[8].mxu1  ;;  %v1623_v5 = vld [vmem:[%s2346_s2 + $0xa8] sm:$0xff] }
 0x1c7   :  { %v696_v11 = vmax.f32 %v694_v8, %v2166_v10  ;;  %v2169_v12 = vpop.f32.mrb[9].mxu1  ;;  %v1628_v8 = vld [vmem:[%s2346_s2 + $0xd0] sm:$0xff] }
 0x1c8   :  { %v695_v13 = vmax.f32 %v693_v9, %v2169_v12  ;;  %v1625_v9 = vld [vmem:[%s2346_s2 + $0xb8] sm:$0xff] }
 0x1c9   :  { %v742_v14 = vsub.f32 %v2154_v1, %v696_v11  ;;  %v764_v15 = vsub.f32 %v2159_v4, %v696_v11  ;;  %v786_v16 = vsub.f32 %v2166_v10, %v696_v11  ;;  %v720_v17 = vsub.f32 %v2146_v61, %v696_v11 }
 0x1ca   :  { %v697_v18 = vsub.f32 %v2144_v60, %v695_v13  ;;  %v719_v19 = vsub.f32 %v2150_v63, %v695_v13  ;;  %v741_v20 = vsub.f32 %v2157_v3, %v695_v13  ;;  %v763_v21 = vsub.f32 %v2162_v6, %v695_v13 }
 0x1cb   :  { %v785_v22 = vsub.f32 %v2169_v12, %v695_v13  ;;  %v698_v24 = vsub.f32 %v2142_v59, %v696_v11  ;;  %v723_v28 = vmul.f32 1.442695, %v720_v17  ;;  %v745_v31 = vmul.f32 1.442695, %v742_v14  ;;  %v1630_v13 = vld [vmem:[%s2346_s2 + $0xe0] sm:$0xff] }
 0x1cc   :  { %v699_v23 = vmul.f32 1.442695, %v697_v18  ;;  %v721_v25 = vmul.f32 1.442695, %v719_v19  ;;  %v743_v26 = vmul.f32 1.442695, %v741_v20  ;;  %v1846_v11 = vpack.c.bf16 %v1628_v8, %v1623_v5 }
 0x1cd   :  { %v765_v27 = vmul.f32 1.442695, %v763_v21  ;;  %v701_v29 = vmul.f32 1.442695, %v698_v24  ;;  %v787_v30 = vmul.f32 1.442695, %v785_v22 }
 0x1ce   :  { %1897 = vpow2.f32 %v699_v23  ;;  %v767_v32 = vmul.f32 1.442695, %v764_v15  ;;  %v789_v35 = vmul.f32 1.442695, %v786_v16  ;;  %v1622_v14 = vld [vmem:[%s2346_s2 + $0xa0] sm:$0xff]  ;;  %v1627_v15 = vld [vmem:[%s2346_s2 + $0xc8] sm:$0xff]  ;;  %v1854_v16 = vpack.c.bf16 %v1630_v13, %v1625_v9  ;;  %1847 = vmatprep.subr.bf16.mxu0 %v1846_v11 }
 0x1cf   :  { %1899 = vpow2.f32 %v721_v25  ;;  %v1848_v17 = vpack.c.bf16 %v1627_v15, %v1622_v14  ;;  %v1624_v18 = vld [vmem:[%s2346_s2 + $0xb0] sm:$0xff]  ;;  %v1629_v19 = vld [vmem:[%s2346_s2 + $0xd8] sm:$0xff]  ;;  %v1638_v23 = vld [vmem:[%s2346_s2 + $0x120] sm:$0xff] }
 0x1d0   :  { %1901 = vpow2.f32 %v743_v26  ;;  %v1856_v21 = vpack.c.bf16 %v1629_v19, %v1624_v18  ;;  %1855 = vmatprep.subr.bf16.mxu1 %v1854_v16  ;;  %v1633_v22 = vld [vmem:[%s2346_s2 + $0xf8] sm:$0xff]  ;;  %v1635_v24 = vld [vmem:[%s2346_s2 + $0x108] sm:$0xff] }
 0x1d1   :  { %1903 = vpow2.f32 %v765_v27  ;;  %1849 = vmatpush1.bf16.msra.mxu0 %v1848_v17  ;;  %v1850_v26 = vpack.c.bf16 %v1638_v23, %v1633_v22  ;;  %v1640_v27 = vld [vmem:[%s2346_s2 + $0x130] sm:$0xff] }
 0x1d2   :  { %1905 = vpow2.f32 %v723_v28  ;;  %1857 = vmatpush1.bf16.msra.mxu1 %v1856_v21  ;;  %v1632_v28 = vld [vmem:[%s2346_s2 + $0xf0] sm:$0xff] }
 0x1d3   :  { %1907 = vpow2.f32 %v701_v29  ;;  %v1637_v29 = vld [vmem:[%s2346_s2 + $0x118] sm:$0xff]  ;;  %1851 = vmatprep.subr.bf16.mxu0 %v1850_v26 }
 0x1d4   :  { %1909 = vpow2.f32 %v787_v30  ;;  %v1858_v30 = vpack.c.bf16 %v1640_v27, %v1635_v24 }
 0x1d5   :  { %1911 = vpow2.f32 %v745_v31  ;;  %v1852_v31 = vpack.c.bf16 %v1637_v29, %v1632_v28 }
 0x1d6   :  { %1913 = vpow2.f32 %v767_v32  ;;  %v1634_v32 = vld [vmem:[%s2346_s2 + $0x100] sm:$0xff]  ;;  %1859 = vmatprep.subr.bf16.mxu1 %v1858_v30 }
 0x1d7   :  { %1915 = vpow2.f32 %v789_v35  ;;  %v1639_v35 = vld [vmem:[%s2346_s2 + $0x128] sm:$0xff]  ;;  %1853 = vmatpush1.bf16.msra.mxu0 %v1852_v31 }
 0x1d8   :  { %v1898_v36 = vpop.eup %1897 }
 0x1d9   :  { %v1900_v37 = vpop.eup %1899 }
 0x1da   :  { %v725_v38 = vadd.f32 %v1900_v37, %v1898_v36  ;;  %v1902_v39 = vpop.eup %1901 }
 0x1db   :  { %v1904_v40 = vpop.eup %1903 }
 0x1dc   :  { %v747_v41 = vadd.f32 %v1902_v39, %v725_v38  ;;  %v1906_v42 = vpop.eup %1905  ;;  %v1631_v38 = vld [vmem:[%s2346_s2 + $0xe8] sm:$0xff] }
 0x1dd   :  { %v1908_v43 = vpop.eup %1907  ;;  %734 = vperm.xlu0 %1896, %v1906_v42  }
 0x1de   :  { %v769_v44 = vadd.f32 %v1904_v40, %v747_v41  ;;  %v1910_v45 = vpop.eup %1909  ;;  %712 = vperm.xlu1 %1895, %v1908_v43   ;;  %v726_v46 = vadd.f32 %v1908_v43, %v1906_v42 }
 0x1df   :  { %v1912_v48 = vpop.eup %1911 }
 0x1e0   :  { %v791_v50 = vadd.f32 %v1910_v45, %v769_v44  ;;  %v748_v52 = vadd.f32 %v1912_v48, %v726_v46  ;;  %v1914_v58 = vpop.eup %1913 }
 0x1e1   :  { %707 = vperm.xlu0 %1896, %v1898_v36   ;;  %v1916_v0 = vpop.eup %1915  ;;  %v1860_v36 = vpack.c.bf16 %v1639_v35, %v1634_v32 }
 0x1e2   :  { %v770_v62 = vadd.f32 %v1914_v58, %v748_v52  ;;  %751 = vperm.xlu1 %1895, %v1902_v39   ;;  %1917 = vrcp.f32 %v791_v50 }
 0x1e3   :  { %1861 = vmatpush1.bf16.msra.mxu1 %v1860_v36 }
 0x1e4   :  { %v792_v2 = vadd.f32 %v1916_v0, %v770_v62 }
 0x1e5   :  { %729 = vperm.xlu0 %1896, %v1900_v37   ;;  %v1626_v37 = vld [vmem:[%s2346_s2 + $0xc0] sm:$0xff] }
 0x1e6   :  { %773 = vperm.xlu1 %1895, %v1904_v40   ;;  %1919 = vrcp.f32 %v792_v2  ;;  %v1862_v39 = vpack.c.bf16 %v1631_v38, %v1626_v37 }
 0x1e8   :  { %1863 = vmatprep.subr.bf16.mxu0 %v1862_v39 }
 0x1e9   :  { %756 = vperm.xlu0 %1896, %v1912_v48  }
 0x1ea   :  { %795 = vperm.xlu1 %1895, %v1910_v45  }
 0x1ec   :  { %v1918_v20 = vpop.eup %1917 }
 0x1ed   :  { %778 = vperm.xlu0 %1896, %v1914_v58  }
 0x1ee   :  { %800 = vperm.xlu1 %1895, %v1916_v0  }
 0x1f0   :  { %v1920_v25 = vpop.eup %1919 }
 0x1f1   :  { %811 = vperm.xlu0 %1896, %v1918_v20  }
 0x1f2   :  { %816 = vperm.xlu1 %1895, %v1920_v25  }
 0x25c   :  { %v735_v40 = vpop.permute.xlu0 %734 }
 0x25d   :  { %v738_v41 = vmul.f32 %v2146_v61, %v735_v40  ;;  %v713_v42 = vpop.permute.xlu1 %712 }
 0x25e   :  { %v716_v43 = vmul.f32 %v2142_v59, %v713_v42 }
 0x260   :  { %v740_v44 = vadd.f32 %v738_v41, %v716_v43  ;;  %v708_v45 = vpop.permute.xlu0 %707 }
 0x261   :  { %v752_v46 = vpop.permute.xlu1 %751  ;;  %v715_v50 = vmul.f32 %v708_v45, %v2144_v60 }
 0x262   :  { %v759_v62 = vmul.f32 %v752_v46, %v2157_v3 }
 0x264   :  { %v730_v48 = vpop.permute.xlu0 %729 }
 0x265   :  { %v774_v52 = vpop.permute.xlu1 %773  ;;  %v737_v58 = vmul.f32 %v730_v48, %v2150_v63 }
 0x266   :  { %v781_v5 = vmul.f32 %v774_v52, %v2162_v6  ;;  %v1636_v6 = vld [vmem:[%s2346_s2 + $0x110] sm:$0xff] }
 0x267   :  { %v739_v0 = vadd.f32 %v737_v58, %v715_v50 }
 0x268   :  { %v757_v2 = vpop.permute.xlu0 %756 }
 0x269   :  { %v761_v8 = vadd.f32 %v759_v62, %v739_v0  ;;  %v796_v61 = vpop.permute.xlu1 %795  ;;  %v760_v9 = vmul.f32 %v2154_v1, %v757_v2  ;;  %v1641_v1 = vld [vmem:[%s2346_s2 + $0x138] sm:$0xff]  ;;  %s1971_s2 = smov [#allocation2]  }
 0x26a   :  { %v803_v59 = vmul.f32 %v796_v61, %v2169_v12  ;;  %v1866_v22 = vpack.c.bf16 %v1641_v1, %v1636_v6  ;;  %s1595_s0 = sshll.u32 %s1971_s2, 4  ;;  %s1596_s0 = int_to_ptr.vmem [resolvable:$true] %s1595_s0 }
 0x26b   :  { %v762_v11 = vadd.f32 %v760_v9, %v740_v44  ;;  %v783_v13 = vadd.f32 %v781_v5, %v761_v8  ;;  %s1945_s4 = scalar_lea.vmem %s1596_s0, 256  ;;  %p1950_p1 = scmp.lt.s32.totalorder %s1596_s0, %s1596_s0 }
 0x26c   :  { %v779_v14 = vpop.permute.xlu0 %778  ;;  %p1946_p0 = scmp.ne.s32.totalorder %s1596_s0, %s1945_s4  ;;  %p1951_p2 = scmp.lt.s32.totalorder %s1945_s4, %s1945_s4 }
 0x26d   :  { %v801_v15 = vpop.permute.xlu1 %800  ;;  %v782_v60 = vmul.f32 %v2159_v4, %v779_v14  ;;  %v805_v16 = vadd.f32 %v803_v59, %v783_v13 }
 0x26e   :  { %v804_v63 = vmul.f32 %v2166_v10, %v801_v15  ;;  %p1952_p3 = por %p1951_p2, %p1950_p1 }
 0x26f   :  { %v784_v3 = vadd.f32 %v782_v60, %v762_v11 }
 0x270   :  { %v812_v17 = vpop.permute.xlu0 %811  ;;  %p1953_p4 = pnand %p1952_p3, %p1946_p0 }
 0x271   :  { %v806_v12 = vadd.f32 %v804_v63, %v784_v3  ;;  %v819_v18 = vmul.f32 %v812_v17, %v805_v16  ;;  %v817_v19 = vpop.permute.xlu1 %816 }
 0x273   :  { %v820_v20 = vmul.f32 %v817_v19, %v806_v12  ;;  %v821_v21 = vmax.f32 %v819_v18, 0.0 }
 0x275   :  { %1642 = vmatmul.mubr.msk.f32.vlgmr.msra.gmra.mrb[10].mxu0 %vm47_vm0, %v821_v21  ;;  %1644 = vmatmul.mubr.msk.f32.vlgmr.msra.gmra.mrb[10].mxu1 %vm47_vm0, %v821_v21  ;;  %v822_v4 = vmax.f32 %v820_v20, 0.0 }
 0x276   :  { %1865 = vmatpush3.bf16.msra.mxu0 %v1862_v39  ;;  %920 = vmatprep.mubr.f32.mxu0 %v1969_v7 }
 0x277   :  { %997 = vmatprep.mubr.f32.mxu1 %v1969_v7  ;;  %1867 = vmatprep.subr.bf16.mxu0 %v1866_v22 }
 0x279   :  { %1643 = vmatmul.mubr.msk.f32.gmra.mrb[12].mxu0 %vm47_vm0, %v822_v4  ;;  %1645 = vmatmul.mubr.msk.f32.gmra.mrb[12].mxu1 %vm47_vm0, %v822_v4 }
 0x27a   :  { %1869 = vmatpush3.bf16.msra.mxu0 %v1866_v22  ;;  %1764 = vmatprep.mubr.msk.f32.mxu0 %vm47_vm0, %v821_v21 }
 0x27b   :  { %1771 = vmatprep.mubr.msk.f32.mxu1 %vm283_vm1, %v2073_v33 }
 0x27d   :  { %1765 = vmatmul.mubr.msk.f32.vlgmr.msra.gmra.mrb[14].mxu0 %vm47_vm0, %v822_v4 }
 0x27e   :  { %1778 = vmatprep.mubr.msk.f32.mxu0 %vm283_vm1, %v2080_v34 }
 0x348   :  { %v916_v10 = vpop.f32.mrb[10].mxu0  ;;  %v993_v23 = vpop.f32.mrb[10].mxu1 }
 0x349   :  { %v918_v24 = vpop.f32.mrb[11].mxu0  ;;  %v995_v7 = vpop.f32.mrb[11].mxu1 }
 0x34c   :  { %v922_v25 = vpop.f32.mrb[12].mxu0  ;;  %v999_v26 = vpop.f32.mrb[12].mxu1 }
 0x34d   :  { %v1870_v27 = vpack.c.bf16 %v922_v25, %v916_v10  ;;  %v1878_v28 = vpack.c.bf16 %v999_v26, %v993_v23  ;;  %v924_v29 = vpop.f32.mrb[13].mxu0  ;;  %v1001_v30 = vpop.f32.mrb[13].mxu1 }
 0x34e   :  { %v1874_v31 = vpack.c.bf16 %v924_v29, %v918_v24  ;;  %v1882_v32 = vpack.c.bf16 %v1001_v30, %v995_v7 }
 0x34f   :  { %1871 = vmatprep.subr.bf16.mxu1 %v1870_v27 }
 0x350   :  { %v1766_v35 = vpop.f32.mrb[14].mxu0  ;;  %1873 = vmatpush3.bf16.msra.mxu1 %v1870_v27  ;;  %1875 = vmatprep.subr.bf16.mxu0 %v1874_v31 }
 0x351   :  { %v1070_v33 = vpop.f32.mrb[15].mxu0  ;;  %1877 = vmatpush3.bf16.msra.mxu0 %v1874_v31  ;;  %1879 = vmatprep.subr.bf16.mxu1 %v1878_v28 }
 0x352   :  { %v1886_v34 = vpack.c.bf16 %v1766_v35, %v1070_v33  ;;  %1883 = vmatprep.subr.bf16.mxu0 %v1882_v32 }
 0x353   :  { %1772 = vmatmul.mubr.msk.f32.vlgmr.msra.gmra.mrb[14].mxu1 %vm283_vm1, %v2087_v47 }
 0x354   :  { %1881 = vmatpush3.bf16.msra.mxu1 %v1878_v28  ;;  %1779 = vmatmul.mubr.msk.f32.vlgmr.msra.gmra.mrb[16].mxu0 %vm283_vm1, %v2092_v49 }
 0x355   :  { %1885 = vmatpush3.bf16.msra.mxu0 %v1882_v32  ;;  %1887 = vmatprep.subr.bf16.mxu1 %v1886_v34 }
 0x356   :  { %1785 = vmatprep.mubr.msk.f32.mxu1 %vm283_vm1, %v2097_v51  ;;  %1792 = vmatprep.mubr.msk.f32.mxu0 %vm283_vm1, %v2104_v53 }
 0x357   :  { %1786 = vmatmul.mubr.msk.f32.vlgmr.msra.gmra.mrb[16].mxu1 %vm283_vm1, %v2111_v54 }
 0x358   :  { %1889 = vmatpush3.bf16.msra.mxu1 %v1886_v34  ;;  %1793 = vmatmul.mubr.msk.f32.vlgmr.msra.gmra.mrb[18].mxu0 %vm283_vm1, %v2118_v55 }
 0x359   :  { %1799 = vmatprep.mubr.msk.f32.mxu1 %vm283_vm1, %v2125_v56 }
 0x35b   :  { %1800 = vmatmul.mubr.msk.f32.vlgmr.msra.gmra.mrb[18].mxu1 %vm283_vm1, %v2134_v57 }
 0x426   :  { %v2280_v47 = vpop.f32.mrb[14].mxu1 }
 0x427   :  { %v2282_v49 = vpop.f32.mrb[16].mxu0  ;;  %v2284_v51 = vpop.f32.mrb[15].mxu1 }
 0x428   :  { %v1455_v53 = vmax.f32 %v2280_v47, %v2282_v49  ;;  %v2288_v54 = vpop.f32.mrb[17].mxu0 }
 0x429   :  { %v1454_v55 = vmax.f32 %v2284_v51, %v2288_v54 }
 0x42a   :  { %v2292_v36 = vpop.f32.mrb[16].mxu1 }
 0x42b   :  { %v1457_v56 = vmax.f32 %v1455_v53, %v2292_v36  ;;  %v2295_v37 = vpop.f32.mrb[17].mxu1  ;;  %v2297_v57 = vpop.f32.mrb[18].mxu0 }
 0x42c   :  { %v1456_v38 = vmax.f32 %v1454_v55, %v2295_v37  ;;  %v2300_v39 = vpop.f32.mrb[19].mxu0 }
 0x42d   :  { %v1459_v40 = vmax.f32 %v1457_v56, %v2297_v57 }
 0x42e   :  { %v1458_v41 = vmax.f32 %v1456_v38, %v2300_v39  ;;  %v2304_v42 = vpop.f32.mrb[18].mxu1 }
 0x42f   :  { %v1461_v43 = vmax.f32 %v1459_v40, %v2304_v42  ;;  %v2307_v44 = vpop.f32.mrb[19].mxu1 }
 0x430   :  { %v1460_v45 = vmax.f32 %v1458_v41, %v2307_v44 }
 0x431   :  { %v1463_v46 = vsub.f32 %v2280_v47, %v1461_v43  ;;  %v1485_v48 = vsub.f32 %v2282_v49, %v1461_v43  ;;  %v1507_v50 = vsub.f32 %v2292_v36, %v1461_v43  ;;  %v1529_v52 = vsub.f32 %v2297_v57, %v1461_v43 }
 0x432   :  { %v1551_v58 = vsub.f32 %v2304_v42, %v1461_v43  ;;  %v1462_v62 = vsub.f32 %v2284_v51, %v1460_v45  ;;  %v1484_v0 = vsub.f32 %v2288_v54, %v1460_v45  ;;  %v1506_v2 = vsub.f32 %v2295_v37, %v1460_v45 }
 0x433   :  { %v1466_v5 = vmul.f32 1.442695, %v1463_v46  ;;  %v1488_v8 = vmul.f32 1.442695, %v1485_v48  ;;  %v1528_v61 = vsub.f32 %v2300_v39, %v1460_v45  ;;  %v1510_v9 = vmul.f32 1.442695, %v1507_v50 }
 0x434   :  { %v1550_v59 = vsub.f32 %v2307_v44, %v1460_v45  ;;  %v1532_v11 = vmul.f32 1.442695, %v1529_v52  ;;  %v1464_v13 = vmul.f32 1.442695, %v1462_v62  ;;  %v1486_v14 = vmul.f32 1.442695, %v1484_v0 }
 0x435   :  { %1921 = vpow2.f32 %v1466_v5  ;;  %v1554_v15 = vmul.f32 1.442695, %v1551_v58  ;;  %v1508_v60 = vmul.f32 1.442695, %v1506_v2  ;;  %v1530_v16 = vmul.f32 1.442695, %v1528_v61 }
 0x436   :  { %1923 = vpow2.f32 %v1488_v8  ;;  %v1552_v63 = vmul.f32 1.442695, %v1550_v59 }
 0x437   :  { %1925 = vpow2.f32 %v1510_v9 }
 0x438   :  { %1927 = vpow2.f32 %v1532_v11 }
 0x439   :  { %1929 = vpow2.f32 %v1464_v13 }
 0x43a   :  { %1931 = vpow2.f32 %v1486_v14 }
 0x43b   :  { %1933 = vpow2.f32 %v1554_v15 }
 0x43c   :  { %1935 = vpow2.f32 %v1508_v60 }
 0x43d   :  { %1937 = vpow2.f32 %v1530_v16 }
 0x43e   :  { %1939 = vpow2.f32 %v1552_v63 }
 0x43f   :  { %v1922_v3 = vpop.eup %1921 }
 0x440   :  { %v1924_v17 = vpop.eup %1923  ;;  %1477 = vperm.xlu1 %1895, %v1922_v3  }
 0x441   :  { %v1491_v6 = vadd.f32 %v1924_v17, %v1922_v3  ;;  %v1926_v1 = vpop.eup %1925 }
 0x442   :  { %v1928_v12 = vpop.eup %1927 }
 0x443   :  { %v1513_v18 = vadd.f32 %v1926_v1, %v1491_v6  ;;  %v1930_v19 = vpop.eup %1929 }
 0x444   :  { %1499 = vperm.xlu1 %1895, %v1924_v17   ;;  %v1932_v20 = vpop.eup %1931  ;;  %1472 = vperm.xlu0 %1896, %v1930_v19  }
 0x445   :  { %v1535_v21 = vadd.f32 %v1928_v12, %v1513_v18  ;;  %v1934_v22 = vpop.eup %1933  ;;  %v1490_v4 = vadd.f32 %v1932_v20, %v1930_v19 }
 0x446   :  { %v1936_v10 = vpop.eup %1935 }
 0x447   :  { %v1557_v23 = vadd.f32 %v1934_v22, %v1535_v21  ;;  %v1512_v24 = vadd.f32 %v1936_v10, %v1490_v4  ;;  %v1938_v7 = vpop.eup %1937 }
 0x448   :  { %1521 = vperm.xlu1 %1895, %v1926_v1   ;;  %1494 = vperm.xlu0 %1896, %v1932_v20   ;;  %v1940_v26 = vpop.eup %1939 }
 0x449   :  { %1941 = vrcp.f32 %v1557_v23  ;;  %v1534_v25 = vadd.f32 %v1938_v7, %v1512_v24 }
 0x44b   :  { %v1556_v27 = vadd.f32 %v1940_v26, %v1534_v25 }
 0x44c   :  { %1543 = vperm.xlu1 %1895, %v1928_v12   ;;  %1516 = vperm.xlu0 %1896, %v1936_v10  }
 0x44d   :  { %1943 = vrcp.f32 %v1556_v27 }
 0x450   :  { %1565 = vperm.xlu1 %1895, %v1934_v22   ;;  %1538 = vperm.xlu0 %1896, %v1938_v7  }
 0x453   :  { %v1942_v28 = vpop.eup %1941 }
 0x454   :  { %1581 = vperm.xlu1 %1895, %v1942_v28   ;;  %1560 = vperm.xlu0 %1896, %v1940_v26  }
 0x457   :  { %v1944_v29 = vpop.eup %1943 }
 0x458   :  { %1576 = vperm.xlu0 %1896, %v1944_v29  }
 0x4bf   :  { %v1478_v30 = vpop.permute.xlu1 %1477 }
 0x4c0   :  { %v1481_v32 = vmul.f32 %v2280_v47, %v1478_v30 }
 0x4c3   :  { %v1500_v31 = vpop.permute.xlu1 %1499  ;;  %v1473_v35 = vpop.permute.xlu0 %1472 }
 0x4c4   :  { %v1503_v33 = vmul.f32 %v2282_v49, %v1500_v31  ;;  %v1480_v38 = vmul.f32 %v1473_v35, %v2284_v51 }
 0x4c6   :  { %v1505_v34 = vadd.f32 %v1503_v33, %v1481_v32 }
 0x4c7   :  { %v1522_v53 = vpop.permute.xlu1 %1521  ;;  %v1495_v55 = vpop.permute.xlu0 %1494 }
 0x4c8   :  { %v1525_v56 = vmul.f32 %v2292_v36, %v1522_v53  ;;  %v1502_v40 = vmul.f32 %v1495_v55, %v2288_v54 }
 0x4ca   :  { %v1527_v41 = vadd.f32 %v1525_v56, %v1505_v34  ;;  %v1504_v43 = vadd.f32 %v1502_v40, %v1480_v38 }
 0x4cb   :  { %v1544_v45 = vpop.permute.xlu1 %1543  ;;  %v1517_v46 = vpop.permute.xlu0 %1516 }
 0x4cc   :  { %v1547_v48 = vmul.f32 %v2297_v57, %v1544_v45  ;;  %v1524_v47 = vmul.f32 %v1517_v46, %v2295_v37 }
 0x4ce   :  { %v1549_v50 = vadd.f32 %v1547_v48, %v1527_v41  ;;  %v1526_v52 = vadd.f32 %v1524_v47, %v1504_v43 }
 0x4cf   :  { %v1566_v49 = vpop.permute.xlu1 %1565  ;;  %v1539_v58 = vpop.permute.xlu0 %1538 }
 0x4d0   :  { %v1569_v62 = vmul.f32 %v2304_v42, %v1566_v49  ;;  %v1546_v36 = vmul.f32 %v1539_v58, %v2300_v39 }
 0x4d2   :  { %v1571_v0 = vadd.f32 %v1569_v62, %v1549_v50  ;;  %v1548_v51 = vadd.f32 %v1546_v36, %v1526_v52 }
 0x4d3   :  { %v1582_v2 = vpop.permute.xlu1 %1581  ;;  %v1561_v54 = vpop.permute.xlu0 %1560 }
 0x4d4   :  { %v1585_v5 = vmul.f32 %v1582_v2, %v1571_v0  ;;  %v1568_v8 = vmul.f32 %v1561_v54, %v2307_v44 }
 0x4d6   :  { %v1587_v61 = vmax.f32 %v1585_v5, 0.0  ;;  %v1570_v9 = vadd.f32 %v1568_v8, %v1548_v51 }
 0x4d7   :  { %v1577_v37 = vpop.permute.xlu0 %1576 }
 0x4d8   :  { %1589 = vst.msk [vmem:[#allocation2 + $0x8] sm:$0xff] %vm47_vm0, %v1587_v61  ;;  %v1584_v57 = vmul.f32 %v1577_v37, %v1570_v9 }
 0x4da   :  { %v1586_v59 = vmax.f32 %v1584_v57, 0.0 }
 0x4dc   :  { %1588 = vst.msk [vmem:[#allocation2] sm:$0xff] %vm47_vm0, %v1586_v59 }
 0x4dd   :  { %1956 = shalt.err (!%p1953_p4)
}
 0x4de   :  { %s1957_s7 = scalar_lea.hbm %s2347_s3, 256 }
 0x4df   :  { %p1958_p5 = scmp.ne.s32.totalorder %s2347_s3, %s1957_s7  ;;  %p1961_p6 = scmp.lt.u32.totalorder %s1957_s7, %s2347_s3 }
 0x4e1   :  { %p1963_p7 = pnand %p1961_p6, %p1958_p5 }
 0x4e3   :  { %1966 = shalt.err (!%p1963_p7)
}
 0x4e4   :  { %s1972_s12 = smov 128   ;;  %s1973_s13 = smov 8  }
 0x4e5   :  { %1601 = dma.vmem_to_hbm [thread:$0]  %s1596_s0, 256, %s2347_s3, [#allocation3], %s1972_s12, %s1972_s12, %s1973_s13  }
 0x4e6   :  { %1967 = dma.done.wait [#allocation3], 256  }
 0x4e7   :  { %1968 = vsyncadd [#allocation3], 4294967040 }
 0x4e8   :  { %1605 = vsyncpa [#allocation3], 1 }

</bundles_post_ra>
